<compile_context>
chip_gen: v7x
topology: tpu7x:2x2x1
jax: 0.10.0
libtpu: 0.0.40
codegen_flags: <defaults>
</compile_context>

<pallas_src>
import math

import jax
import jax.numpy as jnp
from jax.experimental import pallas as pl
from jax.experimental.pallas import tpu as pltpu

_EPS = 1e-5        # nn.BatchNorm1d default eps
_L2_EPS = 1e-12    # robustness eps inside the l2norm rsqrt (avoids 0/0 -> NaN)
_INV_SQRT2 = 1.0 / math.sqrt(2.0)


def _clip_linear_kernel(x_ref, bn1_ref, w1_ref, fcv_ref, w2_ref, out_ref):
    """Both branches (0 = img, 1 = txt), fully VMEM-resident, one body.

    x_ref:   (2, B, D)  f32   stacked encoded features
    bn1_ref: (2, 2, D)  f32   rows: [gamma1; beta1]
    w1_ref:  (2, D, E)  bf16  Linear(D, E) weights, (in, out) layout
    fcv_ref: (2, 4, E)  f32   rows: [b1; gamma2; beta2; b2]
    w2_ref:  (2, E, E)  bf16  Linear(E, E) weights, (in, out) layout
    out_ref: (2, B, E)  f32
    """
    for b in range(2):                       # unrolled at trace time
        x = x_ref[b]                         # (B, D)
        bn1 = bn1_ref[b]                     # (2, D)
        fcv = fcv_ref[b]                     # (4, E)

        # --- BatchNorm1d(D), batch stats, folded affine (one FMA) ---
        mu1 = jnp.mean(x, axis=0, keepdims=True)
        var1 = jnp.mean((x - mu1) ** 2, axis=0, keepdims=True)
        a1 = bn1[0:1] * jax.lax.rsqrt(var1 + _EPS)
        c1 = bn1[1:2] - mu1 * a1
        xn = x * a1 + c1

        # --- Linear(D, E): bf16 operands on the MXU, f32 accumulation ---
        h = jnp.dot(xn.astype(jnp.bfloat16), w1_ref[b],
                    preferred_element_type=jnp.float32) + fcv[0:1]
        # exact (erf) GELU, matching torch.nn.functional.gelu default
        h = 0.5 * h * (1.0 + jax.lax.erf(h * _INV_SQRT2))

        # --- BatchNorm1d(E), batch stats, folded affine ---
        mu2 = jnp.mean(h, axis=0, keepdims=True)
        var2 = jnp.mean((h - mu2) ** 2, axis=0, keepdims=True)
        a2 = fcv[1:2] * jax.lax.rsqrt(var2 + _EPS)
        c2 = fcv[2:3] - mu2 * a2
        hn = h * a2 + c2

        # --- Linear(E, E) ---
        y = jnp.dot(hn.astype(jnp.bfloat16), w2_ref[b],
                    preferred_element_type=jnp.float32) + fcv[3:4]

        # --- l2norm along dim=1 via rsqrt (EUP slot) ---
        inv = jax.lax.rsqrt(jnp.sum(y * y, axis=1, keepdims=True) + _L2_EPS)
        out_ref[b] = y * inv


def clip_linear_forward(images_feat, captions_feat, packed_params):
    """Pallas implementation of Clip_Linear.forward on pre-encoded features.

    images_feat / captions_feat: (B, 512) float32 (output of CLIP encoders).
    packed_params: output of pack_params() (pre-stacked, hoisted out of hot path).
    Returns (img_emb, cap_emb), each (B, embed_size), L2-normalized per row.
    """
    B, D = images_feat.shape
    E = packed_params["w2"].shape[-1]

    # Single cheap activation stack (one 2*B*D concat).
    # TODO(synk): upstream encoders could write directly into this (2,B,D) buffer.
    x = jnp.stack([images_feat, captions_feat]).astype(jnp.float32)

    args = (x, packed_params["bn1"], packed_params["w1"],
            packed_params["fcv"], packed_params["w2"])

    # Advisory cost hint (both branches): 2*M*N*K per matmul, erf per element.
    flops = 2 * 2 * B * (D * E + E * E)
    bytes_accessed = (sum(int(a.size) * a.dtype.itemsize for a in args)
                      + 2 * B * E * 4)
    cost = pl.CostEstimate(flops=flops,
                           transcendentals=2 * B * E,
                           bytes_accessed=bytes_accessed)

    vmem = pl.BlockSpec(memory_space=pltpu.MemorySpace.VMEM)
    out = pl.pallas_call(
        _clip_linear_kernel,
        out_shape=jax.ShapeDtypeStruct((2, B, E), jnp.float32),
        in_specs=[vmem] * len(args),          # full arrays resident in VMEM
        out_specs=vmem,
        cost_estimate=cost,
    )(*args)
    return out[0], out[1]


def make_branch_params(key, in_dim, embed_size):
    """Deterministic synthetic parameters for one (img or txt) branch."""
    k1, k2, k3, k4 = jax.random.split(key, 4)
    return {
        # BatchNorm1d(in_dim): affine gamma/beta
        "g1": jnp.ones((in_dim,), jnp.float32),
        "beta1": jnp.zeros((in_dim,), jnp.float32),
        # Linear(in_dim, embed_size): PyTorch weight is (out,in); store (in,out), bf16
        "w1": (jax.random.normal(k1, (in_dim, embed_size), jnp.float32)
               * 0.02).astype(jnp.bfloat16),
        "b1": jax.random.normal(k2, (embed_size,), jnp.float32) * 0.01,
        # BatchNorm1d(embed_size)
        "g2": jnp.ones((embed_size,), jnp.float32),
        "beta2": jnp.zeros((embed_size,), jnp.float32),
        # Linear(embed_size, embed_size), bf16
        "w2": (jax.random.normal(k3, (embed_size, embed_size), jnp.float32)
               * 0.02).astype(jnp.bfloat16),
        "b2": jax.random.normal(k4, (embed_size,), jnp.float32) * 0.01,
    }


def pack_params(img, txt):
    """One-time parameter stacking/packing (hoisted out of the forward path)."""
    bn1 = jnp.stack([jnp.stack([img["g1"], img["beta1"]]),
                     jnp.stack([txt["g1"], txt["beta1"]])])             # (2,2,D)
    fcv = jnp.stack([jnp.stack([img["b1"], img["g2"], img["beta2"], img["b2"]]),
                     jnp.stack([txt["b1"], txt["g2"], txt["beta2"], txt["b2"]])])  # (2,4,E)
    w1 = jnp.stack([img["w1"], txt["w1"]])                              # (2,D,E) bf16
    w2 = jnp.stack([img["w2"], txt["w2"]])                              # (2,E,E) bf16
    return {"bn1": bn1, "fcv": fcv, "w1": w1, "w2": w2}


def _reference(x, p):
    """Pure-JAX reference mirroring the kernel's bf16 matmul / f32 accumulation."""
    mu = x.mean(0, keepdims=True)
    var = ((x - mu) ** 2).mean(0, keepdims=True)
    xn = (x - mu) * jax.lax.rsqrt(var + _EPS) * p["g1"] + p["beta1"]
    h = jnp.dot(xn.astype(jnp.bfloat16), p["w1"],
                preferred_element_type=jnp.float32) + p["b1"]
    h = 0.5 * h * (1.0 + jax.lax.erf(h / math.sqrt(2.0)))
    mu2 = h.mean(0, keepdims=True)
    var2 = ((h - mu2) ** 2).mean(0, keepdims=True)
    hn = (h - mu2) * jax.lax.rsqrt(var2 + _EPS) * p["g2"] + p["beta2"]
    y = jnp.dot(hn.astype(jnp.bfloat16), p["w2"],
                preferred_element_type=jnp.float32) + p["b2"]
    return y * jax.lax.rsqrt((y * y).sum(1, keepdims=True) + _L2_EPS)


if __name__ == "__main__":
    B = 8            # batch
    CLIP_DIM = 512   # CLIP encoder output dim (fixed by the module)
    EMBED = 128      # args.embed_size

    key = jax.random.PRNGKey(0)
    k_img_x, k_txt_x, k_img_p, k_txt_p = jax.random.split(key, 4)

    # Pre-encoded CLIP features (stand-in for model_clip.encode_image/text).
    images_feat = jax.random.normal(k_img_x, (B, CLIP_DIM), jnp.float32)
    captions_feat = jax.random.normal(k_txt_x, (B, CLIP_DIM), jnp.float32)

    img_params = make_branch_params(k_img_p, CLIP_DIM, EMBED)
    txt_params = make_branch_params(k_txt_p, CLIP_DIM, EMBED)
    packed = jax.block_until_ready(pack_params(img_params, txt_params))  # hoisted, one-time

    img_emb, cap_emb = clip_linear_forward(images_feat, captions_feat, packed)
    jax.block_until_ready((img_emb, cap_emb))

    # sanity check against pure-JAX reference (same bf16/f32 mixed precision)
    ref_img = _reference(images_feat, img_params)
    ref_cap = _reference(captions_feat, txt_params)
    assert img_emb.shape == (B, EMBED) and cap_emb.shape == (B, EMBED)
    assert jnp.allclose(img_emb, ref_img, atol=1e-3, rtol=1e-3)
    assert jnp.allclose(cap_emb, ref_cap, atol=1e-3, rtol=1e-3)
    assert not bool(jnp.isnan(img_emb).any()) and not bool(jnp.isnan(cap_emb).any())

    print("KERNEL_OK")
</pallas_src>

<mosaic_0001>
module attributes {stable_mosaic.version = 11 : i64} {
  func.func @_clip_linear_kernel(%arg0: memref<2x8x512xf32, #tpu.memory_space<vmem>>, %arg1: memref<2x2x512xf32, #tpu.memory_space<vmem>>, %arg2: memref<2x512x128xbf16, #tpu.memory_space<vmem>>, %arg3: memref<2x4x128xf32, #tpu.memory_space<vmem>>, %arg4: memref<2x128x128xbf16, #tpu.memory_space<vmem>>, %arg5: memref<2x8x128xf32, #tpu.memory_space<vmem>>) attributes {dimension_semantics = [], scalar_prefetch = 0 : i64, scratch_operands = 0 : i64, tpu.core_type = #tpu.core_type<tc>} {
    %c0 = arith.constant 0 : index
    %c0_0 = arith.constant 0 : index
    %c0_1 = arith.constant 0 : index
    %0 = vector.load %arg0[%c0, %c0_0, %c0_1] : memref<2x8x512xf32, #tpu.memory_space<vmem>>, vector<1x8x512xf32>
    %1 = vector.shape_cast %0 : vector<1x8x512xf32> to vector<8x512xf32>
    %c0_2 = arith.constant 0 : index
    %c0_3 = arith.constant 0 : index
    %c0_4 = arith.constant 0 : index
    %2 = vector.load %arg1[%c0_2, %c0_3, %c0_4] : memref<2x2x512xf32, #tpu.memory_space<vmem>>, vector<1x2x512xf32>
    %3 = vector.shape_cast %2 : vector<1x2x512xf32> to vector<2x512xf32>
    %c0_5 = arith.constant 0 : index
    %c0_6 = arith.constant 0 : index
    %c0_7 = arith.constant 0 : index
    %4 = vector.load %arg3[%c0_5, %c0_6, %c0_7] : memref<2x4x128xf32, #tpu.memory_space<vmem>>, vector<1x4x128xf32>
    %5 = vector.shape_cast %4 : vector<1x4x128xf32> to vector<4x128xf32>
    %cst = arith.constant dense<0.000000e+00> : vector<512xf32>
    %6 = vector.multi_reduction <add>, %1, %cst [0] : vector<8x512xf32> to vector<512xf32>
    %7 = vector.shape_cast %6 : vector<512xf32> to vector<1x512xf32>
    %cst_8 = arith.constant 8.000000e+00 : f32
    %8 = vector.broadcast %cst_8 : f32 to vector<1x512xf32>
    %9 = arith.divf %7, %8 : vector<1x512xf32>
    %10 = vector.broadcast %9 : vector<1x512xf32> to vector<8x512xf32>
    %11 = arith.subf %1, %10 : vector<8x512xf32>
    %12 = arith.mulf %11, %11 : vector<8x512xf32>
    %cst_9 = arith.constant dense<0.000000e+00> : vector<512xf32>
    %13 = vector.multi_reduction <add>, %12, %cst_9 [0] : vector<8x512xf32> to vector<512xf32>
    %14 = vector.shape_cast %13 : vector<512xf32> to vector<1x512xf32>
    %cst_10 = arith.constant 8.000000e+00 : f32
    %15 = vector.broadcast %cst_10 : f32 to vector<1x512xf32>
    %16 = arith.divf %14, %15 : vector<1x512xf32>
    %17 = vector.extract_strided_slice %3 {offsets = [0, 0], sizes = [1, 512], strides = [1, 1]} : vector<2x512xf32> to vector<1x512xf32>
    %cst_11 = arith.constant 9.99999974E-6 : f32
    %18 = vector.broadcast %cst_11 : f32 to vector<1x512xf32>
    %19 = arith.addf %16, %18 : vector<1x512xf32>
    %20 = math.rsqrt %19 : vector<1x512xf32>
    %21 = arith.mulf %17, %20 : vector<1x512xf32>
    %22 = vector.extract_strided_slice %3 {offsets = [1, 0], sizes = [1, 512], strides = [1, 1]} : vector<2x512xf32> to vector<1x512xf32>
    %23 = arith.mulf %9, %21 : vector<1x512xf32>
    %24 = arith.subf %22, %23 : vector<1x512xf32>
    %25 = vector.broadcast %21 : vector<1x512xf32> to vector<8x512xf32>
    %26 = arith.mulf %1, %25 : vector<8x512xf32>
    %27 = vector.broadcast %24 : vector<1x512xf32> to vector<8x512xf32>
    %28 = arith.addf %26, %27 : vector<8x512xf32>
    %29 = arith.truncf %28 : vector<8x512xf32> to vector<8x512xbf16>
    %c0_12 = arith.constant 0 : index
    %c0_13 = arith.constant 0 : index
    %c0_14 = arith.constant 0 : index
    %30 = vector.load %arg2[%c0_12, %c0_13, %c0_14] : memref<2x512x128xbf16, #tpu.memory_space<vmem>>, vector<1x512x128xbf16>
    %31 = vector.shape_cast %30 : vector<1x512x128xbf16> to vector<512x128xbf16>
    %cst_15 = arith.constant dense<0.000000e+00> : vector<8x128xf32>
    %32 = tpu.matmul %29, %31, %cst_15 {dimension_numbers = #tpu.dot_dimension_numbers<[1], [0], [0], [1], [0, 0, 1, 1], [], []>} : vector<8x512xbf16>, vector<512x128xbf16>, vector<8x128xf32> -> vector<8x128xf32>
    %33 = vector.extract_strided_slice %5 {offsets = [0, 0], sizes = [1, 128], strides = [1, 1]} : vector<4x128xf32> to vector<1x128xf32>
    %34 = vector.broadcast %33 : vector<1x128xf32> to vector<8x128xf32>
    %35 = arith.addf %32, %34 : vector<8x128xf32>
    %cst_16 = arith.constant 5.000000e-01 : f32
    %36 = vector.broadcast %cst_16 : f32 to vector<8x128xf32>
    %37 = arith.mulf %36, %35 : vector<8x128xf32>
    %cst_17 = arith.constant 0.707106769 : f32
    %38 = vector.broadcast %cst_17 : f32 to vector<8x128xf32>
    %39 = arith.mulf %35, %38 : vector<8x128xf32>
    %40 = math.erf %39 : vector<8x128xf32>
    %cst_18 = arith.constant 1.000000e+00 : f32
    %41 = vector.broadcast %cst_18 : f32 to vector<8x128xf32>
    %42 = arith.addf %41, %40 : vector<8x128xf32>
    %43 = arith.mulf %37, %42 : vector<8x128xf32>
    %cst_19 = arith.constant dense<0.000000e+00> : vector<128xf32>
    %44 = vector.multi_reduction <add>, %43, %cst_19 [0] : vector<8x128xf32> to vector<128xf32>
    %45 = vector.shape_cast %44 : vector<128xf32> to vector<1x128xf32>
    %cst_20 = arith.constant 8.000000e+00 : f32
    %46 = vector.broadcast %cst_20 : f32 to vector<1x128xf32>
    %47 = arith.divf %45, %46 : vector<1x128xf32>
    %48 = vector.broadcast %47 : vector<1x128xf32> to vector<8x128xf32>
    %49 = arith.subf %43, %48 : vector<8x128xf32>
    %50 = arith.mulf %49, %49 : vector<8x128xf32>
    %cst_21 = arith.constant dense<0.000000e+00> : vector<128xf32>
    %51 = vector.multi_reduction <add>, %50, %cst_21 [0] : vector<8x128xf32> to vector<128xf32>
    %52 = vector.shape_cast %51 : vector<128xf32> to vector<1x128xf32>
    %cst_22 = arith.constant 8.000000e+00 : f32
    %53 = vector.broadcast %cst_22 : f32 to vector<1x128xf32>
    %54 = arith.divf %52, %53 : vector<1x128xf32>
    %55 = vector.extract_strided_slice %5 {offsets = [1, 0], sizes = [1, 128], strides = [1, 1]} : vector<4x128xf32> to vector<1x128xf32>
    %cst_23 = arith.constant 9.99999974E-6 : f32
    %56 = vector.broadcast %cst_23 : f32 to vector<1x128xf32>
    %57 = arith.addf %54, %56 : vector<1x128xf32>
    %58 = math.rsqrt %57 : vector<1x128xf32>
    %59 = arith.mulf %55, %58 : vector<1x128xf32>
    %60 = vector.extract_strided_slice %5 {offsets = [2, 0], sizes = [1, 128], strides = [1, 1]} : vector<4x128xf32> to vector<1x128xf32>
    %61 = arith.mulf %47, %59 : vector<1x128xf32>
    %62 = arith.subf %60, %61 : vector<1x128xf32>
    %63 = vector.broadcast %59 : vector<1x128xf32> to vector<8x128xf32>
    %64 = arith.mulf %43, %63 : vector<8x128xf32>
    %65 = vector.broadcast %62 : vector<1x128xf32> to vector<8x128xf32>
    %66 = arith.addf %64, %65 : vector<8x128xf32>
    %67 = arith.truncf %66 : vector<8x128xf32> to vector<8x128xbf16>
    %c0_24 = arith.constant 0 : index
    %c0_25 = arith.constant 0 : index
    %c0_26 = arith.constant 0 : index
    %68 = vector.load %arg4[%c0_24, %c0_25, %c0_26] : memref<2x128x128xbf16, #tpu.memory_space<vmem>>, vector<1x128x128xbf16>
    %69 = vector.shape_cast %68 : vector<1x128x128xbf16> to vector<128x128xbf16>
    %cst_27 = arith.constant dense<0.000000e+00> : vector<8x128xf32>
    %70 = tpu.matmul %67, %69, %cst_27 {dimension_numbers = #tpu.dot_dimension_numbers<[1], [0], [0], [1], [0, 0, 1, 1], [], []>} : vector<8x128xbf16>, vector<128x128xbf16>, vector<8x128xf32> -> vector<8x128xf32>
    %71 = vector.extract_strided_slice %5 {offsets = [3, 0], sizes = [1, 128], strides = [1, 1]} : vector<4x128xf32> to vector<1x128xf32>
    %72 = vector.broadcast %71 : vector<1x128xf32> to vector<8x128xf32>
    %73 = arith.addf %70, %72 : vector<8x128xf32>
    %74 = arith.mulf %73, %73 : vector<8x128xf32>
    %cst_28 = arith.constant dense<0.000000e+00> : vector<8xf32>
    %75 = vector.multi_reduction <add>, %74, %cst_28 [1] : vector<8x128xf32> to vector<8xf32>
    %76 = vector.shape_cast %75 : vector<8xf32> to vector<8x1xf32>
    %cst_29 = arith.constant 9.99999996E-13 : f32
    %77 = vector.broadcast %cst_29 : f32 to vector<8x1xf32>
    %78 = arith.addf %76, %77 : vector<8x1xf32>
    %79 = math.rsqrt %78 : vector<8x1xf32>
    %80 = vector.broadcast %79 : vector<8x1xf32> to vector<8x128xf32>
    %81 = arith.mulf %73, %80 : vector<8x128xf32>
    %c0_30 = arith.constant 0 : index
    %c0_31 = arith.constant 0 : index
    %c0_32 = arith.constant 0 : index
    %82 = vector.load %arg5[%c0_30, %c0_31, %c0_32] : memref<2x8x128xf32, #tpu.memory_space<vmem>>, vector<1x8x128xf32>
    %83 = vector.shape_cast %82 : vector<1x8x128xf32> to vector<8x128xf32>
    %84 = vector.shape_cast %81 : vector<8x128xf32> to vector<1x8x128xf32>
    tpu.vector_store %arg5[%c0_30, %c0_31, %c0_32], %84 {strides = array<i32>} : memref<2x8x128xf32, #tpu.memory_space<vmem>>, vector<1x8x128xf32>,
    %c1 = arith.constant 1 : index
    %c0_33 = arith.constant 0 : index
    %c0_34 = arith.constant 0 : index
    %85 = vector.load %arg0[%c1, %c0_33, %c0_34] : memref<2x8x512xf32, #tpu.memory_space<vmem>>, vector<1x8x512xf32>
    %86 = vector.shape_cast %85 : vector<1x8x512xf32> to vector<8x512xf32>
    %c1_35 = arith.constant 1 : index
    %c0_36 = arith.constant 0 : index
    %c0_37 = arith.constant 0 : index
    %87 = vector.load %arg1[%c1_35, %c0_36, %c0_37] : memref<2x2x512xf32, #tpu.memory_space<vmem>>, vector<1x2x512xf32>
    %88 = vector.shape_cast %87 : vector<1x2x512xf32> to vector<2x512xf32>
    %c1_38 = arith.constant 1 : index
    %c0_39 = arith.constant 0 : index
    %c0_40 = arith.constant 0 : index
    %89 = vector.load %arg3[%c1_38, %c0_39, %c0_40] : memref<2x4x128xf32, #tpu.memory_space<vmem>>, vector<1x4x128xf32>
    %90 = vector.shape_cast %89 : vector<1x4x128xf32> to vector<4x128xf32>
    %cst_41 = arith.constant dense<0.000000e+00> : vector<512xf32>
    %91 = vector.multi_reduction <add>, %86, %cst_41 [0] : vector<8x512xf32> to vector<512xf32>
    %92 = vector.shape_cast %91 : vector<512xf32> to vector<1x512xf32>
    %cst_42 = arith.constant 8.000000e+00 : f32
    %93 = vector.broadcast %cst_42 : f32 to vector<1x512xf32>
    %94 = arith.divf %92, %93 : vector<1x512xf32>
    %95 = vector.broadcast %94 : vector<1x512xf32> to vector<8x512xf32>
    %96 = arith.subf %86, %95 : vector<8x512xf32>
    %97 = arith.mulf %96, %96 : vector<8x512xf32>
    %cst_43 = arith.constant dense<0.000000e+00> : vector<512xf32>
    %98 = vector.multi_reduction <add>, %97, %cst_43 [0] : vector<8x512xf32> to vector<512xf32>
    %99 = vector.shape_cast %98 : vector<512xf32> to vector<1x512xf32>
    %cst_44 = arith.constant 8.000000e+00 : f32
    %100 = vector.broadcast %cst_44 : f32 to vector<1x512xf32>
    %101 = arith.divf %99, %100 : vector<1x512xf32>
    %102 = vector.extract_strided_slice %88 {offsets = [0, 0], sizes = [1, 512], strides = [1, 1]} : vector<2x512xf32> to vector<1x512xf32>
    %cst_45 = arith.constant 9.99999974E-6 : f32
    %103 = vector.broadcast %cst_45 : f32 to vector<1x512xf32>
    %104 = arith.addf %101, %103 : vector<1x512xf32>
    %105 = math.rsqrt %104 : vector<1x512xf32>
    %106 = arith.mulf %102, %105 : vector<1x512xf32>
    %107 = vector.extract_strided_slice %88 {offsets = [1, 0], sizes = [1, 512], strides = [1, 1]} : vector<2x512xf32> to vector<1x512xf32>
    %108 = arith.mulf %94, %106 : vector<1x512xf32>
    %109 = arith.subf %107, %108 : vector<1x512xf32>
    %110 = vector.broadcast %106 : vector<1x512xf32> to vector<8x512xf32>
    %111 = arith.mulf %86, %110 : vector<8x512xf32>
    %112 = vector.broadcast %109 : vector<1x512xf32> to vector<8x512xf32>
    %113 = arith.addf %111, %112 : vector<8x512xf32>
    %114 = arith.truncf %113 : vector<8x512xf32> to vector<8x512xbf16>
    %c1_46 = arith.constant 1 : index
    %c0_47 = arith.constant 0 : index
    %c0_48 = arith.constant 0 : index
    %115 = vector.load %arg2[%c1_46, %c0_47, %c0_48] : memref<2x512x128xbf16, #tpu.memory_space<vmem>>, vector<1x512x128xbf16>
    %116 = vector.shape_cast %115 : vector<1x512x128xbf16> to vector<512x128xbf16>
    %cst_49 = arith.constant dense<0.000000e+00> : vector<8x128xf32>
    %117 = tpu.matmul %114, %116, %cst_49 {dimension_numbers = #tpu.dot_dimension_numbers<[1], [0], [0], [1], [0, 0, 1, 1], [], []>} : vector<8x512xbf16>, vector<512x128xbf16>, vector<8x128xf32> -> vector<8x128xf32>
    %118 = vector.extract_strided_slice %90 {offsets = [0, 0], sizes = [1, 128], strides = [1, 1]} : vector<4x128xf32> to vector<1x128xf32>
    %119 = vector.broadcast %118 : vector<1x128xf32> to vector<8x128xf32>
    %120 = arith.addf %117, %119 : vector<8x128xf32>
    %cst_50 = arith.constant 5.000000e-01 : f32
    %121 = vector.broadcast %cst_50 : f32 to vector<8x128xf32>
    %122 = arith.mulf %121, %120 : vector<8x128xf32>
    %cst_51 = arith.constant 0.707106769 : f32
    %123 = vector.broadcast %cst_51 : f32 to vector<8x128xf32>
    %124 = arith.mulf %120, %123 : vector<8x128xf32>
    %125 = math.erf %124 : vector<8x128xf32>
    %cst_52 = arith.constant 1.000000e+00 : f32
    %126 = vector.broadcast %cst_52 : f32 to vector<8x128xf32>
    %127 = arith.addf %126, %125 : vector<8x128xf32>
    %128 = arith.mulf %122, %127 : vector<8x128xf32>
    %cst_53 = arith.constant dense<0.000000e+00> : vector<128xf32>
    %129 = vector.multi_reduction <add>, %128, %cst_53 [0] : vector<8x128xf32> to vector<128xf32>
    %130 = vector.shape_cast %129 : vector<128xf32> to vector<1x128xf32>
    %cst_54 = arith.constant 8.000000e+00 : f32
    %131 = vector.broadcast %cst_54 : f32 to vector<1x128xf32>
    %132 = arith.divf %130, %131 : vector<1x128xf32>
    %133 = vector.broadcast %132 : vector<1x128xf32> to vector<8x128xf32>
    %134 = arith.subf %128, %133 : vector<8x128xf32>
    %135 = arith.mulf %134, %134 : vector<8x128xf32>
    %cst_55 = arith.constant dense<0.000000e+00> : vector<128xf32>
    %136 = vector.multi_reduction <add>, %135, %cst_55 [0] : vector<8x128xf32> to vector<128xf32>
    %137 = vector.shape_cast %136 : vector<128xf32> to vector<1x128xf32>
    %cst_56 = arith.constant 8.000000e+00 : f32
    %138 = vector.broadcast %cst_56 : f32 to vector<1x128xf32>
    %139 = arith.divf %137, %138 : vector<1x128xf32>
    %140 = vector.extract_strided_slice %90 {offsets = [1, 0], sizes = [1, 128], strides = [1, 1]} : vector<4x128xf32> to vector<1x128xf32>
    %cst_57 = arith.constant 9.99999974E-6 : f32
    %141 = vector.broadcast %cst_57 : f32 to vector<1x128xf32>
    %142 = arith.addf %139, %141 : vector<1x128xf32>
    %143 = math.rsqrt %142 : vector<1x128xf32>
    %144 = arith.mulf %140, %143 : vector<1x128xf32>
    %145 = vector.extract_strided_slice %90 {offsets = [2, 0], sizes = [1, 128], strides = [1, 1]} : vector<4x128xf32> to vector<1x128xf32>
    %146 = arith.mulf %132, %144 : vector<1x128xf32>
    %147 = arith.subf %145, %146 : vector<1x128xf32>
    %148 = vector.broadcast %144 : vector<1x128xf32> to vector<8x128xf32>
    %149 = arith.mulf %128, %148 : vector<8x128xf32>
    %150 = vector.broadcast %147 : vector<1x128xf32> to vector<8x128xf32>
    %151 = arith.addf %149, %150 : vector<8x128xf32>
    %152 = arith.truncf %151 : vector<8x128xf32> to vector<8x128xbf16>
    %c1_58 = arith.constant 1 : index
    %c0_59 = arith.constant 0 : index
    %c0_60 = arith.constant 0 : index
    %153 = vector.load %arg4[%c1_58, %c0_59, %c0_60] : memref<2x128x128xbf16, #tpu.memory_space<vmem>>, vector<1x128x128xbf16>
    %154 = vector.shape_cast %153 : vector<1x128x128xbf16> to vector<128x128xbf16>
    %cst_61 = arith.constant dense<0.000000e+00> : vector<8x128xf32>
    %155 = tpu.matmul %152, %154, %cst_61 {dimension_numbers = #tpu.dot_dimension_numbers<[1], [0], [0], [1], [0, 0, 1, 1], [], []>} : vector<8x128xbf16>, vector<128x128xbf16>, vector<8x128xf32> -> vector<8x128xf32>
    %156 = vector.extract_strided_slice %90 {offsets = [3, 0], sizes = [1, 128], strides = [1, 1]} : vector<4x128xf32> to vector<1x128xf32>
    %157 = vector.broadcast %156 : vector<1x128xf32> to vector<8x128xf32>
    %158 = arith.addf %155, %157 : vector<8x128xf32>
    %159 = arith.mulf %158, %158 : vector<8x128xf32>
    %cst_62 = arith.constant dense<0.000000e+00> : vector<8xf32>
    %160 = vector.multi_reduction <add>, %159, %cst_62 [1] : vector<8x128xf32> to vector<8xf32>
    %161 = vector.shape_cast %160 : vector<8xf32> to vector<8x1xf32>
    %cst_63 = arith.constant 9.99999996E-13 : f32
    %162 = vector.broadcast %cst_63 : f32 to vector<8x1xf32>
    %163 = arith.addf %161, %162 : vector<8x1xf32>
    %164 = math.rsqrt %163 : vector<8x1xf32>
    %165 = vector.broadcast %164 : vector<8x1xf32> to vector<8x128xf32>
    %166 = arith.mulf %158, %165 : vector<8x128xf32>
    %c1_64 = arith.constant 1 : index
    %c0_65 = arith.constant 0 : index
    %c0_66 = arith.constant 0 : index
    %167 = vector.load %arg5[%c1_64, %c0_65, %c0_66] : memref<2x8x128xf32, #tpu.memory_space<vmem>>, vector<1x8x128xf32>
    %168 = vector.shape_cast %167 : vector<1x8x128xf32> to vector<8x128xf32>
    %169 = vector.shape_cast %166 : vector<8x128xf32> to vector<1x8x128xf32>
    tpu.vector_store %arg5[%c1_64, %c0_65, %c0_66], %169 {strides = array<i32>} : memref<2x8x128xf32, #tpu.memory_space<vmem>>, vector<1x8x128xf32>,
    return
  }
}

</mosaic_0001>

<bundles_post_ra>
// kernel: tpu_custom_call.1
= control target key start
LH: loop header
LB: loop body
LE: loop exit
PB: predicated region body
PF: predicated region fallthrough
CT: control target
= control target key end

     0   :  { %10 = vsyncpa [#allocation3], 0  ;;  %s2293_s0 = inlined_call_operand.hbm [shape: f32[2,8,512], index: 0, kind: input, shape index: {}]   ;;  %s2294_s1 = inlined_call_operand.hbm [shape: f32[2,2,512], index: 1, kind: input, shape index: {}]   ;;  %s2295_s2 = inlined_call_operand.hbm [shape: bf16[2,512,128], index: 2, kind: input, shape index: {}]   ;;  %s2296_s3 = inlined_call_operand.vmem [shape: f32[2,4,128], index: 3, kind: input, shape index: {}]   ;;  %s2297_s4 = inlined_call_operand.hbm [shape: bf16[2,128,128], index: 4, kind: input, shape index: {}]   ;;  %s2298_s5 = inlined_call_operand.hbm [shape: f32[2,8,128], index: 5, kind: output, shape index: {}]  }
   0x1   :  { %11 = vsyncpa [#allocation6], 0 }
   0x2   :  { %12 = vsyncpa [#allocation9], 0 }
   0x3   :  { %13 = vsyncpa [#allocation4], 0  ;;  %s1990_s18 = smov [#allocation5]   ;;  %s1872_s22 = scalar_lea.hbm %s2294_s1, 256 }
   0x4   :  { %s31_s19 = sshll.u32 %s1990_s18, 4  ;;  %p1873_p0 = scmp.ne.s32.totalorder %s2294_s1, %s1872_s22  ;;  %s32_s19 = int_to_ptr.vmem [resolvable:$true] %s31_s19 }
   0x5   :  { %p1876_p1 = scmp.lt.u32.totalorder %s1872_s22, %s2294_s1 }
   0x7   :  { %p1878_p2 = pnand %p1876_p1, %p1873_p0 }
   0x9   :  { %1881 = shalt.err (!%p1878_p2)
}
   0xa   :  { %s1882_s27 = scalar_lea.vmem %s32_s19, 256  ;;  %p1887_p4 = scmp.lt.s32.totalorder %s32_s19, %s32_s19 }
   0xb   :  { %p1883_p3 = scmp.ne.s32.totalorder %s32_s19, %s1882_s27  ;;  %p1888_p5 = scmp.lt.s32.totalorder %s1882_s27, %s1882_s27 }
   0xd   :  { %p1889_p6 = por %p1888_p5, %p1887_p4 }
   0xf   :  { %p1890_p7 = pnand %p1889_p6, %p1883_p3 }
  0x11   :  { %1893 = shalt.err (!%p1890_p7)
}
  0x12   :  { %s1991_s28 = smov 128   ;;  %s1992_s29 = smov 8  }
  0x13   :  { %37 = dma.hbm_to_vmem [thread:$0]  %s2294_s1, 256, %s32_s19, [#allocation6], %s1991_s28, %s1991_s28, %s1992_s29  }
  0x14   :  { %s1993_s7 = smov [#allocation2]   ;;  %s1894_s11 = scalar_lea.hbm %s2293_s0, 1024 }
  0x15   :  { %s19_s8 = sshll.u32 %s1993_s7, 4  ;;  %p1895_p8 = scmp.ne.s32.totalorder %s2293_s0, %s1894_s11  ;;  %s20_s8 = int_to_ptr.vmem [resolvable:$true] %s19_s8 }
  0x16   :  { %p1898_p9 = scmp.lt.u32.totalorder %s1894_s11, %s2293_s0 }
  0x18   :  { %p1900_p10 = pnand %p1898_p9, %p1895_p8 }
  0x1a   :  { %1903 = shalt.err (!%p1900_p10)
}
  0x1b   :  { %s1904_s16 = scalar_lea.vmem %s20_s8, 1024  ;;  %p1909_p12 = scmp.lt.s32.totalorder %s20_s8, %s20_s8 }
  0x1c   :  { %p1905_p11 = scmp.ne.s32.totalorder %s20_s8, %s1904_s16  ;;  %p1910_p13 = scmp.lt.s32.totalorder %s1904_s16, %s1904_s16 }
  0x1e   :  { %p1911_p0 = por %p1910_p13, %p1909_p12 }
  0x20   :  { %p1912_p1 = pnand %p1911_p0, %p1905_p11 }
  0x22   :  { %1915 = shalt.err (!%p1912_p1)
}
  0x23   :  { %s1994_s1 = smov 512   ;;  %s1995_s17 = smov 32  }
  0x24   :  { %25 = dma.hbm_to_vmem [thread:$0]  %s2293_s0, 1024, %s20_s8, [#allocation3], %s1994_s1, %s1994_s1, %s1995_s17  }
  0x25   :  { %s1996_s20 = smov [#allocation7]   ;;  %s1916_s24 = scalar_lea.hbm %s2295_s2, 8192 }
  0x26   :  { %s43_s21 = sshll.u32 %s1996_s20, 4  ;;  %p1917_p2 = scmp.ne.s32.totalorder %s2295_s2, %s1916_s24  ;;  %s44_s21 = int_to_ptr.vmem [resolvable:$true] %s43_s21 }
  0x27   :  { %p1920_p3 = scmp.lt.u32.totalorder %s1916_s24, %s2295_s2 }
  0x29   :  { %p1922_p4 = pnand %p1920_p3, %p1917_p2 }
  0x2b   :  { %1925 = shalt.err (!%p1922_p4)
}
  0x2c   :  { %s1926_s6 = scalar_lea.vmem %s44_s21, 8192  ;;  %p1931_p6 = scmp.lt.s32.totalorder %s44_s21, %s44_s21 }
  0x2d   :  { %p1927_p5 = scmp.ne.s32.totalorder %s44_s21, %s1926_s6  ;;  %p1932_p7 = scmp.lt.s32.totalorder %s1926_s6, %s1926_s6 }
  0x2f   :  { %p1933_p8 = por %p1932_p7, %p1931_p6 }
  0x31   :  { %p1934_p9 = pnand %p1933_p8, %p1927_p5 }
  0x33   :  { %1937 = shalt.err (!%p1934_p9)
}
  0x34   :  { %s1997_s0 = smov 64   ;;  %s1998_s7 = smov 4  }
  0x35   :  { %49 = dma.hbm_to_vmem [thread:$0]  %s2295_s2, 8192, %s44_s21, [#allocation6], %s1997_s0, %s1997_s0, %s1998_s7  }
  0x36   :  { %s1999_s10 = smov [#allocation8]   ;;  %s1938_s14 = scalar_lea.hbm %s2297_s4, 2048 }
  0x37   :  { %s57_s11 = sshll.u32 %s1999_s10, 4  ;;  %p1939_p10 = scmp.ne.s32.totalorder %s2297_s4, %s1938_s14  ;;  %s58_s11 = int_to_ptr.vmem [resolvable:$true] %s57_s11 }
  0x38   :  { %p1942_p11 = scmp.lt.u32.totalorder %s1938_s14, %s2297_s4 }
  0x3a   :  { %p1944_p12 = pnand %p1942_p11, %p1939_p10 }
  0x3c   :  { %1947 = shalt.err (!%p1944_p12)
}
  0x3d   :  { %s1948_s18 = scalar_lea.vmem %s58_s11, 2048  ;;  %p1953_p0 = scmp.lt.s32.totalorder %s58_s11, %s58_s11 }
  0x3e   :  { %p1949_p13 = scmp.ne.s32.totalorder %s58_s11, %s1948_s18  ;;  %p1954_p1 = scmp.lt.s32.totalorder %s1948_s18, %s1948_s18 }
  0x40   :  { %p1955_p2 = por %p1954_p1, %p1953_p0 }
  0x42   :  { %p1956_p3 = pnand %p1955_p2, %p1949_p13 }
  0x44   :  { %1959 = shalt.err (!%p1956_p3)
}
  0x45   :  { %63 = dma.hbm_to_vmem [thread:$0]  %s2297_s4, 2048, %s58_s11, [#allocation9], %s1997_s0, %s1997_s0, %s1998_s7  }
  0x46   :  { %1982 = dma.done.wait [#allocation3], 1024  }
  0x47   :  { %1983 = vsyncadd [#allocation3], 4294966272 }
  0x48   :  { %1984 = dma.done.wait [#allocation6], 8448  }
  0x49   :  { %1985 = vsyncadd [#allocation6], 4294958848 }
  0x4a   :  { %1986 = dma.done.wait [#allocation9], 2048  }
  0x4b   :  { %1987 = vsyncadd [#allocation9], 4294965248  ;;  %v1764_v0 = vld [vmem:[#allocation7 + $0x40] sm:$0xff]   ;;  %v1768_v4 = vld [vmem:[#allocation7 + $0x48] sm:$0xff]   ;;  %vm2002_vm0 = vmmov 0  }
  0x4c   :  { %v1765_v1 = vld [vmem:[#allocation7 + $0xc0] sm:$0xff]   ;;  %1604 = vmatprep.subr.bf16.mxu0 %v1764_v0  ;;  %v1769_v5 = vld [vmem:[#allocation7 + $0xc8] sm:$0xff]   ;;  %v1772_v8 = vld [vmem:[#allocation7 + $0x50] sm:$0xff]  }
  0x4d   :  { %v1766_v2 = vld [vmem:[#allocation7] sm:$0xff]   ;;  %1626 = vmatprep.subr.bf16.mxu1 %v1765_v1  ;;  %v1770_v6 = vld [vmem:[#allocation7 + $0x8] sm:$0xff]   ;;  %v1773_v9 = vld [vmem:[#allocation7 + $0xd0] sm:$0xff]  }
  0x4e   :  { %v1767_v3 = vld [vmem:[#allocation7 + $0x80] sm:$0xff]   ;;  %1605 = vmatpush3.bf16.msra.mxu0 %v1766_v2  ;;  %v1771_v7 = vld [vmem:[#allocation7 + $0x88] sm:$0xff]   ;;  %v1774_v10 = vld [vmem:[#allocation7 + $0x10] sm:$0xff]  }
  0x4f   :  { %1627 = vmatpush3.bf16.msra.mxu1 %v1767_v3  ;;  %1606 = vmatprep.subr.bf16.mxu0 %v1768_v4  ;;  %v1775_v11 = vld [vmem:[#allocation7 + $0x90] sm:$0xff]   ;;  %v1776_v12 = vld [vmem:[#allocation7 + $0x58] sm:$0xff]   ;;  %v1780_v16 = vld [vmem:[#allocation7 + $0x60] sm:$0xff]  }
  0x50   :  { %1628 = vmatprep.subr.bf16.mxu1 %v1769_v5  ;;  %v1777_v13 = vld [vmem:[#allocation7 + $0xd8] sm:$0xff]   ;;  %v1781_v17 = vld [vmem:[#allocation7 + $0xe0] sm:$0xff]   ;;  %v1784_v20 = vld [vmem:[#allocation7 + $0x68] sm:$0xff]  }
  0x51   :  { %v1778_v14 = vld [vmem:[#allocation7 + $0x18] sm:$0xff]   ;;  %v1782_v18 = vld [vmem:[#allocation7 + $0x20] sm:$0xff]   ;;  %v1785_v21 = vld [vmem:[#allocation7 + $0xe8] sm:$0xff]  }
  0x52   :  { %1607 = vmatpush3.bf16.msra.mxu0 %v1770_v6  ;;  %v1779_v15 = vld [vmem:[#allocation7 + $0x98] sm:$0xff]   ;;  %v1783_v19 = vld [vmem:[#allocation7 + $0xa0] sm:$0xff]   ;;  %v1786_v22 = vld [vmem:[#allocation7 + $0x28] sm:$0xff]  }
  0x53   :  { %1629 = vmatpush3.bf16.msra.mxu1 %v1771_v7  ;;  %1608 = vmatprep.subr.bf16.mxu0 %v1772_v8  ;;  %v1787_v23 = vld [vmem:[#allocation7 + $0xa8] sm:$0xff]   ;;  %v1788_v24 = vld [vmem:[#allocation7 + $0x70] sm:$0xff]   ;;  %v1792_v28 = vld [vmem:[#allocation7 + $0x78] sm:$0xff]  }
  0x54   :  { %1630 = vmatprep.subr.bf16.mxu1 %v1773_v9  ;;  %v1789_v25 = vld [vmem:[#allocation7 + $0xf0] sm:$0xff]   ;;  %v1793_v29 = vld [vmem:[#allocation7 + $0xf8] sm:$0xff]   ;;  %v2089_v34 = vld [vmem:[#allocation2 + $0x10] sm:$0xff] }
  0x55   :  { %v1790_v26 = vld [vmem:[#allocation7 + $0x30] sm:$0xff]   ;;  %v1794_v30 = vld [vmem:[#allocation7 + $0x38] sm:$0xff]   ;;  %v2091_v35 = vld [vmem:[#allocation2 + $0x18] sm:$0xff]  ;;  %v95_v38 = vrot.slane %v2089_v34, 4 }
  0x56   :  { %1609 = vmatpush3.bf16.msra.mxu0 %v1774_v10  ;;  %v1791_v27 = vld [vmem:[#allocation7 + $0xb0] sm:$0xff]   ;;  %v1795_v31 = vld [vmem:[#allocation7 + $0xb8] sm:$0xff]   ;;  %v101_v39 = vrot.slane %v2091_v35, 4 }
  0x57   :  { %1631 = vmatpush3.bf16.msra.mxu1 %v1775_v11  ;;  %1610 = vmatprep.subr.bf16.mxu0 %v1776_v12  ;;  %v2085_v32 = vld [vmem:[#allocation2] sm:$0xff]  ;;  %v2087_v33 = vld [vmem:[#allocation2 + $0x8] sm:$0xff]  ;;  %v96_v42 = vadd.f32 %v95_v38, %v2089_v34 }
  0x58   :  { %1632 = vmatprep.subr.bf16.mxu1 %v1777_v13  ;;  %v83_v36 = vrot.slane %v2085_v32, 4  ;;  %v89_v37 = vrot.slane %v2087_v33, 4  ;;  %v102_v43 = vadd.f32 %v101_v39, %v2091_v35 }
  0x59   :  { %v97_v46 = vrot.slane %v96_v42, 2 }
  0x5a   :  { %1611 = vmatpush3.bf16.msra.mxu0 %v1778_v14  ;;  %v84_v40 = vadd.f32 %v83_v36, %v2085_v32  ;;  %v90_v41 = vadd.f32 %v89_v37, %v2087_v33  ;;  %v103_v47 = vrot.slane %v102_v43, 2 }
  0x5b   :  { %1633 = vmatpush3.bf16.msra.mxu1 %v1779_v15  ;;  %1612 = vmatprep.subr.bf16.mxu0 %v1780_v16  ;;  %v98_v50 = vadd.f32 %v97_v46, %v96_v42  ;;  %v2000_v46 = vmov 1983009808  }
  0x5c   :  { %1634 = vmatprep.subr.bf16.mxu1 %v1781_v17  ;;  %v85_v44 = vrot.slane %v84_v40, 2  ;;  %v91_v45 = vrot.slane %v90_v41, 2  ;;  %v104_v51 = vadd.f32 %v103_v47, %v102_v43  ;;  %v163_v47 = vunpack.c.l.s4 %v2000_v46  ;;  %v2172_v46 = vld [vmem:[#allocation2 + $0x28] sm:$0xff] }
  0x5d   :  { %v99_v54 = vrot.slane %v98_v50, 1 }
  0x5e   :  { %1613 = vmatpush3.bf16.msra.mxu0 %v1782_v18  ;;  %v86_v48 = vadd.f32 %v85_v44, %v84_v40  ;;  %v92_v49 = vadd.f32 %v91_v45, %v90_v41  ;;  %v105_v55 = vrot.slane %v104_v51, 1 }
  0x5f   :  { %1635 = vmatpush3.bf16.msra.mxu1 %v1783_v19  ;;  %1614 = vmatprep.subr.bf16.mxu0 %v1784_v20  ;;  %v100_v58 = vadd.f32 %v99_v54, %v98_v50 }
  0x60   :  { %1636 = vmatprep.subr.bf16.mxu1 %v1785_v21  ;;  %v87_v52 = vrot.slane %v86_v48, 1  ;;  %v93_v53 = vrot.slane %v92_v49, 1  ;;  %v106_v59 = vadd.f32 %v105_v55, %v104_v51 }
  0x61   :  { %v2105_v62 = vmul.f32 0.125, %v100_v58  ;;  %v81_v58 = vld [vmem:[#allocation5] sm:$0xff] }
  0x62   :  { %1615 = vmatpush3.bf16.msra.mxu0 %v1786_v22  ;;  %v88_v56 = vadd.f32 %v87_v52, %v86_v48  ;;  %v94_v57 = vadd.f32 %v93_v53, %v92_v49  ;;  %v2107_v63 = vmul.f32 0.125, %v106_v59  ;;  %v164_v48 = vunpack.c.0.s8 %v163_v47  ;;  %v2174_v47 = vld [vmem:[#allocation2 + $0x30] sm:$0xff] }
  0x63   :  { %1637 = vmatpush3.bf16.msra.mxu1 %v1787_v23  ;;  %1616 = vmatprep.subr.bf16.mxu0 %v1788_v24  ;;  %v114_v2 = vsub.f32 %v2089_v34, %v2105_v62 }
  0x64   :  { %1638 = vmatprep.subr.bf16.mxu1 %v1789_v25  ;;  %v2101_v60 = vmul.f32 0.125, %v88_v56  ;;  %v2103_v61 = vmul.f32 0.125, %v94_v57  ;;  %v115_v3 = vsub.f32 %v2091_v35, %v2107_v63 }
  0x65   :  { %v118_v6 = vmul.f32 %v114_v2, %v114_v2 }
  0x66   :  { %1617 = vmatpush3.bf16.msra.mxu0 %v1790_v26  ;;  %v112_v0 = vsub.f32 %v2085_v32, %v2101_v60  ;;  %v113_v1 = vsub.f32 %v2087_v33, %v2103_v61  ;;  %v119_v7 = vmul.f32 %v115_v3, %v115_v3 }
  0x67   :  { %1639 = vmatpush3.bf16.msra.mxu1 %v1791_v27  ;;  %1618 = vmatprep.subr.bf16.mxu0 %v1792_v28  ;;  %v132_v10 = vrot.slane %v118_v6, 4  ;;  %v165_v28 = vlaneseq }
  0x68   :  { %1640 = vmatprep.subr.bf16.mxu1 %v1793_v29  ;;  %v116_v4 = vmul.f32 %v112_v0, %v112_v0  ;;  %v117_v5 = vmul.f32 %v113_v1, %v113_v1  ;;  %v138_v11 = vrot.slane %v119_v7, 4 }
  0x69   :  { %v133_v14 = vadd.f32 %v132_v10, %v118_v6  ;;  %v2117_v41 = vshrl.u32 %v165_v28, 7 }
  0x6a   :  { %1619 = vmatpush3.bf16.msra.mxu0 %v1794_v30  ;;  %v120_v8 = vrot.slane %v116_v4, 4  ;;  %v126_v9 = vrot.slane %v117_v5, 4  ;;  %v139_v15 = vadd.f32 %v138_v11, %v119_v7 }
  0x6b   :  { %1641 = vmatpush3.bf16.msra.mxu1 %v1795_v31  ;;  %v134_v18 = vrot.slane %v133_v14, 2  ;;  %v2120_v50 = vsub.s32 %v164_v48, %v2117_v41  ;;  %v2125_v59 = vsub.s32 0, %v2117_v41  ;;  %v2128_v1 = vsub.s32 2, %v2117_v41  ;;  %v2176_v48 = vld [vmem:[#allocation2 + $0x38] sm:$0xff] }
  0x6c   :  { %v121_v12 = vadd.f32 %v120_v8, %v116_v4  ;;  %v127_v13 = vadd.f32 %v126_v9, %v117_v5  ;;  %v140_v19 = vrot.slane %v139_v15, 2  ;;  %v190_v2 = vsub.s32 4, %v2117_v41 }
  0x6d   :  { %v135_v22 = vadd.f32 %v134_v18, %v133_v14  ;;  %v194_v3 = vsub.s32 6, %v2117_v41  ;;  %v2145_v18 = vsub.s32 1, %v2117_v41 }
  0x6e   :  { %v122_v16 = vrot.slane %v121_v12, 2  ;;  %v128_v17 = vrot.slane %v127_v13, 2  ;;  %v141_v23 = vadd.f32 %v140_v19, %v139_v15 }
  0x6f   :  { %v136_v26 = vrot.slane %v135_v22, 1 }
  0x70   :  { %v123_v20 = vadd.f32 %v122_v16, %v121_v12  ;;  %v129_v21 = vadd.f32 %v128_v17, %v127_v13  ;;  %v142_v27 = vrot.slane %v141_v23, 1 }
  0x71   :  { %v137_v31 = vadd.f32 %v136_v26, %v135_v22  ;;  %v259_v22 = vsub.s32 5, %v2117_v41 }
  0x72   :  { %v124_v24 = vrot.slane %v123_v20, 1  ;;  %v130_v25 = vrot.slane %v129_v21, 1  ;;  %v143_v36 = vadd.f32 %v142_v27, %v141_v23 }
  0x73   :  { %v146_v39 = vmul.f32 0.125, %v137_v31 }
  0x74   :  { %v125_v29 = vadd.f32 %v124_v24, %v123_v20  ;;  %v131_v30 = vadd.f32 %v130_v25, %v129_v21  ;;  %v147_v40 = vmul.f32 0.125, %v143_v36  ;;  %v263_v21 = vsub.s32 7, %v2117_v41 }
  0x75   :  { %v150_v44 = vadd.f32 1e-05, %v146_v39 }
  0x76   :  { %v144_v37 = vmul.f32 0.125, %v125_v29  ;;  %v145_v38 = vmul.f32 0.125, %v131_v30  ;;  %v151_v45 = vadd.f32 1e-05, %v147_v40 }
  0x78   :  { %v148_v42 = vadd.f32 1e-05, %v144_v37  ;;  %v149_v43 = vadd.f32 1e-05, %v145_v38 }
  0x7a   :  { %1844 = vrsqrt.f32 %v148_v42 }
  0x7b   :  { %1846 = vrsqrt.f32 %v149_v43 }
  0x7c   :  { %1848 = vrsqrt.f32 %v150_v44 }
  0x7d   :  { %1850 = vrsqrt.f32 %v151_v45  ;;  %v2170_v45 = vld [vmem:[#allocation2 + $0x20] sm:$0xff] }
  0x84   :  { %v1845_v49 = vpop.eup %1844 }
  0x85   :  { %v1847_v51 = vpop.eup %1846 }
  0x86   :  { %v1849_v52 = vpop.eup %1848  ;;  %v160_v53 = vcombine.low %v1845_v49, %v1847_v51  ;;  %v797_v49 = vrot.slane %v2170_v45, 4  ;;  %v803_v51 = vrot.slane %v2172_v46, 4 }
  0x87   :  { %v1851_v54 = vpop.eup %1850 }
  0x88   :  { %v161_v55 = vcombine.low %v1849_v52, %v1851_v54  ;;  %v168_v56 = vrot.slane %v160_v53, %v2120_v50  ;;  %v809_v52 = vrot.slane %v2174_v47, 4  ;;  %v815_v53 = vrot.slane %v2176_v48, 4 }
  0x89   :  { %v798_v54 = vadd.f32 %v797_v49, %v2170_v45  ;;  %v1798_v49 = vld [vmem:[#allocation8 + $0x10] sm:$0xff]  }
  0x8a   :  { %v175_v57 = vrot.slane %v161_v55, %v2120_v50  ;;  %v804_v55 = vadd.f32 %v803_v51, %v2172_v46 }
  0x8c   :  { %v176_v0 = vcombine.low %v168_v56, %v175_v57  ;;  %v810_v56 = vadd.f32 %v809_v52, %v2174_v47  ;;  %v816_v57 = vadd.f32 %v815_v53, %v2176_v48 }
  0x8e   :  { %v178_v4 = vmul.f32 %v176_v0, %v81_v58  ;;  %v805_v0 = vrot.slane %v804_v55, 2 }
  0x90   :  { %v183_v5 = vrot.slane %v178_v4, %v2125_v59  ;;  %v187_v6 = vrot.slane %v178_v4, %v2128_v1  ;;  %v191_v7 = vrot.slane %v178_v4, %v190_v2  ;;  %v195_v8 = vrot.slane %v178_v4, %v194_v3 }
  0x91   :  { %v811_v4 = vrot.slane %v810_v56, 2 }
  0x92   :  { %v200_v9 = vmul.f32 %v183_v5, %v2101_v60  ;;  %v201_v10 = vmul.f32 %v187_v6, %v2103_v61  ;;  %v202_v11 = vmul.f32 %v191_v7, %v2105_v62  ;;  %v203_v12 = vmul.f32 %v195_v8, %v2107_v63 }
  0x93   :  { %v235_v19 = vrot.slane %v187_v6, %v2125_v59  ;;  %v243_v60 = vrot.slane %v195_v8, %v2125_v59  ;;  %v231_v61 = vrot.slane %v183_v5, %v2125_v59  ;;  %v239_v62 = vrot.slane %v191_v7, %v2125_v59 }
  0x94   :  { %v208_v13 = vcombine.low %v200_v9, %v201_v10  ;;  %v209_v14 = vcombine.low %v202_v11, %v203_v12  ;;  %v2152_v63 = vsub.s32 3, %v2117_v41  ;;  %v817_v5 = vrot.slane %v816_v57, 2  ;;  %v2252_v41 = vld [vmem:[%s2296_s3] sm:$0xf] }
  0x95   :  { %v245_v24 = vmul.f32 %v235_v19, %v2087_v33  ;;  %v247_v25 = vmul.f32 %v243_v60, %v2091_v35  ;;  %v244_v26 = vmul.f32 %v231_v61, %v2085_v32  ;;  %v246_v27 = vmul.f32 %v239_v62, %v2089_v34 }
  0x96   :  { %v216_v15 = vrot.slane %v208_v13, %v2120_v50  ;;  %v223_v16 = vrot.slane %v209_v14, %v2120_v50  ;;  %v806_v7 = vadd.f32 %v805_v0, %v804_v55  ;;  %v812_v8 = vadd.f32 %v811_v4, %v810_v56  ;;  %v1799_v55 = vld [vmem:[#allocation8 + $0x18] sm:$0xff]   ;;  %v1803_v56 = vld [vmem:[#allocation7 + $0x140] sm:$0xff]   ;;  %v1806_v0 = vld [vmem:[#allocation7 + $0x148] sm:$0xff]  }
  0x97   :  { %v818_v9 = vadd.f32 %v817_v5, %v816_v57  ;;  %v1804_v57 = vld [vmem:[#allocation7 + $0x100] sm:$0xff]   ;;  %1657 = vmatprep.subr.bf16.mxu1 %v1803_v56 }
  0x98   :  { %v224_v17 = vcombine.low %v216_v15, %v223_v16  ;;  %v807_v11 = vrot.slane %v806_v7, 1  ;;  %v813_v12 = vrot.slane %v812_v8, 1  ;;  %v1818_v56 = vld [vmem:[#allocation7 + $0x160] sm:$0xff]  }
  0x99   :  { %v819_v13 = vrot.slane %v818_v9, 1 }
  0x9a   :  { %v225_v20 = vrot.slane %v224_v17, 7  ;;  %v808_v15 = vadd.f32 %v807_v11, %v806_v7  ;;  %v814_v16 = vadd.f32 %v813_v12, %v812_v8  ;;  %v1807_v8 = vld [vmem:[#allocation7 + $0x108] sm:$0xff]   ;;  %v1800_v12 = vld [vmem:[#allocation8 + $0x20] sm:$0xff]  }
  0x9b   :  { %v820_v17 = vadd.f32 %v819_v13, %v818_v9 }
  0x9c   :  { %v227_v23 = vsub.f32 %v81_v58, %v225_v20  ;;  %v799_v58 = vrot.slane %v798_v54, 2  ;;  %v2188_v60 = vmul.f32 0.125, %v808_v15  ;;  %v2190_v61 = vmul.f32 0.125, %v814_v16 }
  0x9d   :  { %v2192_v62 = vmul.f32 0.125, %v820_v17 }
  0x9e   :  { %v256_v28 = vrot.slane %v227_v23, %v2152_v63  ;;  %v264_v29 = vrot.slane %v227_v23, %v263_v21  ;;  %v252_v30 = vrot.slane %v227_v23, %v2145_v18  ;;  %v260_v31 = vrot.slane %v227_v23, %v259_v22 }
  0x9f   :  { %v800_v6 = vadd.f32 %v799_v58, %v798_v54  ;;  %v826_v23 = vsub.f32 %v2172_v46, %v2188_v60 }
  0xa0   :  { %v276_v36 = vrot.slane %v256_v28, %v2145_v18  ;;  %v284_v33 = vrot.slane %v264_v29, %v2145_v18  ;;  %v272_v35 = vrot.slane %v252_v30, %v2145_v18  ;;  %v280_v32 = vrot.slane %v260_v31, %v2145_v18 }
  0xa1   :  { %v801_v10 = vrot.slane %v800_v6, 1  ;;  %v830_v29 = vmul.f32 %v826_v23, %v826_v23 }
  0xa2   :  { %v286_v37 = vadd.f32 %v276_v36, %v245_v24  ;;  %v288_v34 = vadd.f32 %v284_v33, %v247_v25  ;;  %v285_v38 = vadd.f32 %v272_v35, %v244_v26  ;;  %v287_v39 = vadd.f32 %v280_v32, %v246_v27  ;;  %v1796_v25 = vld [vmem:[#allocation8] sm:$0xff]   ;;  %v1797_v32 = vld [vmem:[#allocation8 + $0x8] sm:$0xff]  }
  0xa3   :  { %v802_v14 = vadd.f32 %v801_v10, %v800_v6  ;;  %v827_v24 = vsub.f32 %v2174_v47, %v2190_v61  ;;  %v828_v26 = vsub.f32 %v2176_v48, %v2192_v62  ;;  %v2001_v27 = vmov 0.0  }
  0xa4   :  { %v290_v40 = vpack.c.bf16 %v286_v37, %v286_v37  ;;  %v292_v42 = vpack.c.bf16 %v288_v34, %v288_v34  ;;  %v289_v43 = vpack.c.bf16 %v285_v38, %v285_v38  ;;  %v291_v44 = vpack.c.bf16 %v287_v39, %v287_v39  ;;  %1710 = vmatprep.subr.bf16.mxu0 %v2001_v27 }
  0xa5   :  { %v2186_v19 = vmul.f32 0.125, %v802_v14  ;;  %v831_v30 = vmul.f32 %v827_v24, %v827_v24  ;;  %v832_v31 = vmul.f32 %v828_v26, %v828_v26  ;;  %v839_v33 = vrot.slane %v830_v29, 4 }
  0xa6   :  { %585 = vmatprep.mubr.bf16.mxu0 %v290_v40  ;;  %625 = vmatprep.mubr.bf16.mxu1 %v292_v42 }
  0xa7   :  { %586 = vmatmul.mubr.bf16.vlgmr.msra.gmra.mrb[0].mxu0 %v289_v43  ;;  %626 = vmatmul.mubr.bf16.vlgmr.msra.gmra.mrb[0].mxu1 %v291_v44  ;;  %v825_v20 = vsub.f32 %v2170_v45, %v2186_v19  ;;  %v845_v35 = vrot.slane %v831_v30, 4  ;;  %v851_v37 = vrot.slane %v832_v31, 4  ;;  %v840_v38 = vadd.f32 %v839_v33, %v830_v29  ;;  %v1805_v29 = vld [vmem:[#allocation8 + $0x38] sm:$0xff]  }
  0xa8   :  { %1711 = vmatpush3.bf16.msra.mxu0 %v1796_v25  ;;  %1726 = vmatprep.mubr.msk.bf16.mxu0 %vm2002_vm0, %v2001_v27  ;;  %v1801_v25 = vld [vmem:[#allocation8 + $0x28] sm:$0xff]  }
  0xa9   :  { %v829_v28 = vmul.f32 %v825_v20, %v825_v20  ;;  %1712 = vmatprep.subr.bf16.mxu0 %v2001_v27  ;;  %v846_v39 = vadd.f32 %v845_v35, %v831_v30  ;;  %v852_v40 = vadd.f32 %v851_v37, %v832_v31  ;;  %v841_v43 = vrot.slane %v840_v38, 2  ;;  %1658 = vmatpush3.bf16.msra.mxu1 %v1804_v57  ;;  %v1808_v30 = vld [vmem:[#allocation7 + $0x1c0] sm:$0xff]  }
  0xaa   :  { %1659 = vmatprep.subr.bf16.mxu1 %v1806_v0  ;;  %v1819_v57 = vld [vmem:[#allocation7 + $0x120] sm:$0xff]  }
  0xab   :  { %v833_v36 = vrot.slane %v829_v28, 4  ;;  %v847_v44 = vrot.slane %v846_v39, 2  ;;  %v853_v51 = vrot.slane %v852_v40, 2  ;;  %v842_v53 = vadd.f32 %v841_v43, %v840_v38  ;;  %v1810_v38 = vld [vmem:[#allocation7 + $0x150] sm:$0xff]  }
  0xac   :  { %1713 = vmatpush3.bf16.msra.mxu0 %v1797_v32 }
  0xad   :  { %v834_v34 = vadd.f32 %v833_v36, %v829_v28  ;;  %1714 = vmatprep.subr.bf16.mxu0 %v2001_v27  ;;  %v848_v54 = vadd.f32 %v847_v44, %v846_v39  ;;  %v854_v58 = vadd.f32 %v853_v51, %v852_v40  ;;  %v843_v5 = vrot.slane %v842_v53, 1  ;;  %1660 = vmatpush3.bf16.msra.mxu1 %v1807_v8  ;;  %v1802_v28 = vld [vmem:[#allocation8 + $0x30] sm:$0xff]   ;;  %v1814_v44 = vld [vmem:[#allocation7 + $0x158] sm:$0xff]   ;;  %v1822_v8 = vld [vmem:[#allocation7 + $0x168] sm:$0xff]  }
  0xae   :  { %v1811_v39 = vld [vmem:[#allocation7 + $0x110] sm:$0xff]   ;;  %1661 = vmatprep.subr.bf16.mxu1 %v1810_v38 }
  0xaf   :  { %v835_v42 = vrot.slane %v834_v34, 2  ;;  %v849_v6 = vrot.slane %v848_v54, 1  ;;  %v855_v7 = vrot.slane %v854_v58, 1  ;;  %v844_v10 = vadd.f32 %v843_v5, %v842_v53 }
  0xb0   :  { %1715 = vmatpush3.bf16.msra.mxu0 %v1798_v49  ;;  %v1815_v49 = vld [vmem:[#allocation7 + $0x118] sm:$0xff]  }
  0xb1   :  { %v836_v52 = vadd.f32 %v835_v42, %v834_v34  ;;  %1716 = vmatprep.subr.bf16.mxu0 %v2001_v27  ;;  %v850_v11 = vadd.f32 %v849_v6, %v848_v54  ;;  %v856_v13 = vadd.f32 %v855_v7, %v854_v58  ;;  %v858_v15 = vmul.f32 0.125, %v844_v10  ;;  %v794_v42 = vld [vmem:[#allocation5 + $0x8] sm:$0xff]  ;;  %1662 = vmatpush3.bf16.msra.mxu1 %v1811_v39 }
  0xb2   :  { %1663 = vmatprep.subr.bf16.mxu1 %v1814_v44 }
  0xb3   :  { %v837_v4 = vrot.slane %v836_v52, 1  ;;  %v859_v16 = vmul.f32 0.125, %v850_v11  ;;  %v860_v17 = vmul.f32 0.125, %v856_v13  ;;  %v862_v23 = vadd.f32 1e-05, %v858_v15  ;;  %v1827_v11 = vld [vmem:[#allocation7 + $0x130] sm:$0xff]  }
  0xb4   :  { %1717 = vmatpush3.bf16.msra.mxu0 %v1799_v55  ;;  %v1830_v13 = vld [vmem:[#allocation7 + $0x178] sm:$0xff]  }
  0xb5   :  { %v838_v9 = vadd.f32 %v837_v4, %v836_v52  ;;  %1718 = vmatprep.subr.bf16.mxu0 %v2001_v27  ;;  %v863_v24 = vadd.f32 1e-05, %v859_v16  ;;  %v864_v26 = vadd.f32 1e-05, %v860_v17  ;;  %1664 = vmatpush3.bf16.msra.mxu1 %v1815_v49 }
  0xb6   :  { %1665 = vmatprep.subr.bf16.mxu1 %v1818_v56 }
  0xb7   :  { %v857_v14 = vmul.f32 0.125, %v838_v9 }
  0xb8   :  { %1719 = vmatpush3.bf16.msra.mxu0 %v1800_v12 }
  0xb9   :  { %v861_v20 = vadd.f32 1e-05, %v857_v14  ;;  %1720 = vmatprep.subr.bf16.mxu0 %v2001_v27  ;;  %1666 = vmatpush3.bf16.msra.mxu1 %v1819_v57  ;;  %v1831_v14 = vld [vmem:[#allocation7 + $0x138] sm:$0xff]  }
  0xba   :  { %1667 = vmatprep.subr.bf16.mxu1 %v1822_v8 }
  0xbb   :  { %1852 = vrsqrt.f32 %v861_v20 }
  0xbc   :  { %1854 = vrsqrt.f32 %v862_v23  ;;  %1721 = vmatpush3.bf16.msra.mxu0 %v1801_v25 }
  0xbd   :  { %1856 = vrsqrt.f32 %v863_v24  ;;  %1722 = vmatprep.subr.bf16.mxu0 %v2001_v27 }
  0xbe   :  { %1858 = vrsqrt.f32 %v864_v26 }
  0xc0   :  { %1723 = vmatpush3.bf16.msra.mxu0 %v1802_v28 }
  0xc1   :  { %1724 = vmatprep.subr.bf16.mxu0 %v2001_v27 }
  0xc4   :  { %1725 = vmatpush3.bf16.msra.mxu0 %v1805_v29 }
  0xc5   :  { %v1853_v31 = vpop.eup %1852  ;;  %1679 = vmatprep.subr.bf16.mxu0 %v1808_v30 }
  0xc6   :  { %v1855_v36 = vpop.eup %1854 }
  0xc7   :  { %v1857_v33 = vpop.eup %1856  ;;  %v873_v35 = vcombine.low %v1853_v31, %v1855_v36 }
  0xc8   :  { %v1859_v32 = vpop.eup %1858 }
  0xc9   :  { %v874_v37 = vcombine.low %v1857_v33, %v1859_v32  ;;  %v881_v34 = vrot.slane %v873_v35, %v2120_v50 }
  0xcb   :  { %v888_v40 = vrot.slane %v874_v37, %v2120_v50 }
  0xcd   :  { %v889_v43 = vcombine.low %v881_v34, %v888_v40 }
  0xcf   :  { %v891_v51 = vmul.f32 %v889_v43, %v794_v42 }
  0xd1   :  { %v896_v52 = vrot.slane %v891_v51, %v2125_v59  ;;  %v900_v53 = vrot.slane %v891_v51, %v2128_v1  ;;  %v904_v54 = vrot.slane %v891_v51, %v190_v2  ;;  %v908_v55 = vrot.slane %v891_v51, %v194_v3  ;;  %v1823_v2 = vld [vmem:[#allocation7 + $0x128] sm:$0xff]  }
  0xd2   :  { %1668 = vmatpush3.bf16.msra.mxu1 %v1823_v2 }
  0xd3   :  { %v913_v58 = vmul.f32 %v896_v52, %v2186_v19  ;;  %v914_v0 = vmul.f32 %v900_v53, %v2188_v60  ;;  %v915_v4 = vmul.f32 %v904_v54, %v2190_v61  ;;  %v916_v5 = vmul.f32 %v908_v55, %v2192_v62  ;;  %v1826_v19 = vld [vmem:[#allocation7 + $0x170] sm:$0xff]  }
  0xd4   :  { %v948_v61 = vrot.slane %v900_v53, %v2125_v59  ;;  %1669 = vmatprep.subr.bf16.mxu1 %v1826_v19  ;;  %v944_v12 = vrot.slane %v896_v52, %v2125_v59  ;;  %v956_v24 = vrot.slane %v908_v55, %v2125_v59  ;;  %v952_v26 = vrot.slane %v904_v54, %v2125_v59 }
  0xd5   :  { %v921_v6 = vcombine.low %v913_v58, %v914_v0  ;;  %v922_v7 = vcombine.low %v915_v4, %v916_v5 }
  0xd6   :  { %1670 = vmatpush3.bf16.msra.mxu1 %v1827_v11  ;;  %v958_v15 = vmul.f32 %v948_v61, %v2172_v46  ;;  %v960_v29 = vmul.f32 %v956_v24, %v2176_v48  ;;  %v959_v31 = vmul.f32 %v952_v26, %v2174_v47  ;;  %v360_v47 = vrot.slane %v2252_v41, %v2125_v59  ;;  %v1809_v24 = vld [vmem:[#allocation7 + $0x180] sm:$0xff]  }
  0xd7   :  { %v929_v9 = vrot.slane %v921_v6, %v2120_v50  ;;  %v936_v3 = vrot.slane %v922_v7, %v2120_v50  ;;  %v957_v50 = vmul.f32 %v944_v12, %v2170_v45  ;;  %1671 = vmatprep.subr.bf16.mxu1 %v1830_v13 }
  0xd9   :  { %v937_v10 = vcombine.low %v929_v9, %v936_v3 }
  0xda   :  { %1672 = vmatpush3.bf16.msra.mxu1 %v1831_v14 }
  0xdb   :  { %v938_v60 = vrot.slane %v937_v10, 7  ;;  %1730 = vmatprep.subr.bf16.mxu1 %v2001_v27 }
  0xdd   :  { %v940_v62 = vsub.f32 %v794_v42, %v938_v60 }
  0xdf   :  { %v969_v16 = vrot.slane %v940_v62, %v2152_v63  ;;  %v965_v17 = vrot.slane %v940_v62, %v2145_v18  ;;  %v977_v25 = vrot.slane %v940_v62, %v263_v21  ;;  %v973_v46 = vrot.slane %v940_v62, %v259_v22 }
  0xe1   :  { %v989_v20 = vrot.slane %v969_v16, %v2145_v18  ;;  %v985_v23 = vrot.slane %v965_v17, %v2145_v18  ;;  %v997_v30 = vrot.slane %v977_v25, %v2145_v18  ;;  %v993_v36 = vrot.slane %v973_v46, %v2145_v18  ;;  %v1812_v46 = vld [vmem:[#allocation7 + $0x1c8] sm:$0xff]  }
  0xe3   :  { %v999_v28 = vadd.f32 %v989_v20, %v958_v15  ;;  %v998_v45 = vadd.f32 %v985_v23, %v957_v50  ;;  %v1001_v35 = vadd.f32 %v997_v30, %v960_v29  ;;  %v2245_v32 = vadd.f32 %v993_v36, %v959_v31  ;;  %v1817_v29 = vld [vmem:[#allocation7 + $0x190] sm:$0xff]   ;;  %v1820_v30 = vld [vmem:[#allocation7 + $0x1d8] sm:$0xff]   ;;  %v1824_v36 = vld [vmem:[#allocation7 + $0x1e0] sm:$0xff]  }
  0xe4   :  { %v1821_v31 = vld [vmem:[#allocation7 + $0x198] sm:$0xff]  }
  0xe5   :  { %v1003_v33 = vpack.c.bf16 %v999_v28, %v999_v28  ;;  %v1002_v21 = vpack.c.bf16 %v998_v45, %v998_v45  ;;  %v1005_v25 = vpack.c.bf16 %v1001_v35, %v1001_v35  ;;  %v1813_v28 = vld [vmem:[#allocation7 + $0x188] sm:$0xff]   ;;  %v1816_v45 = vld [vmem:[#allocation7 + $0x1d0] sm:$0xff]  }
  0xe6   :  { %v1829_v35 = vld [vmem:[#allocation7 + $0x1a8] sm:$0xff]  }
  0xe7   :  { %1299 = vmatprep.mubr.bf16.mxu1 %v1003_v33  ;;  %v1825_v33 = vld [vmem:[#allocation7 + $0x1a0] sm:$0xff]  }
  0xe8   :  { %1300 = vmatmul.mubr.bf16.vlgmr.msra.gmra.mrb[4].mxu1 %v1002_v21  ;;  %v1828_v21 = vld [vmem:[#allocation7 + $0x1e8] sm:$0xff]  }
  0xe9   :  { %1746 = vmatprep.mubr.msk.bf16.mxu1 %vm2002_vm0, %v2001_v27 }
 0x17a   :  { %v1620_v22 = vpop.f32.mrb[0].mxu0  ;;  %v1642_v48 = vpop.f32.mrb[0].mxu1 }
 0x17b   :  { %v1621_v37 = vpop.f32.mrb[1].mxu0  ;;  %v1643_v34 = vpop.f32.mrb[1].mxu1 }
 0x17c   :  { %v1622_v38 = vadd.f32 %v1621_v37, %v1620_v22  ;;  %v1644_v39 = vadd.f32 %v1643_v34, %v1642_v48  ;;  %v1623_v40 = vpop.f32.mrb[2].mxu0  ;;  %v1645_v42 = vpop.f32.mrb[2].mxu1  ;;  %v1832_v22 = vld [vmem:[#allocation7 + $0x1f0] sm:$0xff]   ;;  %v1835_v37 = vld [vmem:[#allocation7 + $0x1b8] sm:$0xff]   ;;  %v1004_v34 = vpack.c.bf16 %v2245_v32, %v2245_v32  ;;  %v1840_v32 = vld [vmem:[#allocation8 + $0x60] sm:$0xff]  }
 0x17d   :  { %v1624_v43 = vpop.f32.mrb[3].mxu0  ;;  %v1646_v44 = vpop.f32.mrb[3].mxu1  ;;  %v1833_v48 = vld [vmem:[#allocation7 + $0x1b0] sm:$0xff]  }
 0x17e   :  { %v588_v49 = vadd.f32 %v1622_v38, %v360_v47  ;;  %v1834_v47 = vld [vmem:[#allocation7 + $0x1f8] sm:$0xff]   ;;  %v1836_v44 = vld [vmem:[#allocation8 + $0x40] sm:$0xff]  }
 0x17f   :  { %1731 = vmatpush3.bf16.msra.mxu1 %v1836_v44 }
 0x180   :  { %v628_v51 = vadd.f32 %v1644_v39, %v588_v49  ;;  %1732 = vmatprep.subr.bf16.mxu1 %v2001_v27  ;;  %v1837_v49 = vld [vmem:[#allocation8 + $0x48] sm:$0xff]  }
 0x182   :  { %v634_v52 = vmul.f32 0.70710677, %v628_v51  ;;  %v633_v54 = vmul.f32 0.5, %v628_v51  ;;  %v1838_v51 = vld [vmem:[#allocation8 + $0x50] sm:$0xff]  }
 0x183   :  { %1733 = vmatpush3.bf16.msra.mxu1 %v1837_v49 }
 0x184   :  { %1860 = verf.f32 %v634_v52  ;;  %1734 = vmatprep.subr.bf16.mxu1 %v2001_v27  ;;  %v1839_v52 = vld [vmem:[#allocation8 + $0x58] sm:$0xff]  }
 0x187   :  { %1735 = vmatpush3.bf16.msra.mxu1 %v1838_v51 }
 0x188   :  { %1736 = vmatprep.subr.bf16.mxu1 %v2001_v27 }
 0x18b   :  { %1737 = vmatpush3.bf16.msra.mxu1 %v1839_v52 }
 0x18c   :  { %1738 = vmatprep.subr.bf16.mxu1 %v2001_v27 }
 0x18e   :  { %v1861_v53 = vpop.eup %1860 }
 0x18f   :  { %v636_v55 = vadd.f32 1.0, %v1861_v53  ;;  %1739 = vmatpush3.bf16.msra.mxu1 %v1840_v32  ;;  %v1841_v53 = vld [vmem:[#allocation8 + $0x68] sm:$0xff]  }
 0x190   :  { %1740 = vmatprep.subr.bf16.mxu1 %v2001_v27 }
 0x191   :  { %v637_v56 = vmul.f32 %v636_v55, %v633_v54  ;;  %v1842_v54 = vld [vmem:[#allocation8 + $0x70] sm:$0xff]   ;;  %v1843_v55 = vld [vmem:[#allocation8 + $0x78] sm:$0xff]  }
 0x193   :  { %v638_v57 = vrot.slane %v637_v56, 4  ;;  %1741 = vmatpush3.bf16.msra.mxu1 %v1841_v53 }
 0x194   :  { %1742 = vmatprep.subr.bf16.mxu1 %v2001_v27 }
 0x195   :  { %v639_v58 = vadd.f32 %v638_v57, %v637_v56 }
 0x197   :  { %v640_v0 = vrot.slane %v639_v58, 2  ;;  %1743 = vmatpush3.bf16.msra.mxu1 %v1842_v54 }
 0x198   :  { %1744 = vmatprep.subr.bf16.mxu1 %v2001_v27 }
 0x199   :  { %v641_v4 = vadd.f32 %v640_v0, %v639_v58 }
 0x19b   :  { %v642_v5 = vrot.slane %v641_v4, 1  ;;  %1745 = vmatpush3.bf16.msra.mxu1 %v1843_v55 }
 0x19d   :  { %v643_v6 = vadd.f32 %v642_v5, %v641_v4 }
 0x19f   :  { %v644_v7 = vmul.f32 0.125, %v643_v6 }
 0x1a1   :  { %v645_v8 = vsub.f32 %v637_v56, %v644_v7 }
 0x1a3   :  { %v646_v2 = vmul.f32 %v645_v8, %v645_v8 }
 0x1a5   :  { %v647_v9 = vrot.slane %v646_v2, 4 }
 0x1a7   :  { %v648_v3 = vadd.f32 %v647_v9, %v646_v2 }
 0x1a9   :  { %v649_v10 = vrot.slane %v648_v3, 2 }
 0x1ab   :  { %v650_v19 = vadd.f32 %v649_v10, %v648_v3 }
 0x1ad   :  { %v651_v11 = vrot.slane %v650_v19, 1 }
 0x1af   :  { %v652_v60 = vadd.f32 %v651_v11, %v650_v19 }
 0x1b1   :  { %v653_v61 = vmul.f32 0.125, %v652_v60 }
 0x1b3   :  { %v654_v62 = vadd.f32 1e-05, %v653_v61 }
 0x1b5   :  { %1862 = vrsqrt.f32 %v654_v62 }
 0x1bb   :  { %v1673_v38 = vpop.f32.mrb[4].mxu1 }
 0x1bc   :  { %v1674_v39 = vpop.f32.mrb[5].mxu1 }
 0x1bd   :  { %v1675_v40 = vadd.f32 %v1674_v39, %v1673_v38  ;;  %v1676_v42 = vpop.f32.mrb[6].mxu1 }
 0x1be   :  { %v1677_v43 = vpop.f32.mrb[7].mxu1 }
 0x1bf   :  { %v1863_v12 = vpop.eup %1862 }
 0x1c0   :  { %v656_v13 = vmul.f32 %v1863_v12, %v2252_v41 }
 0x1c2   :  { %v657_v14 = vmul.f32 %v656_v13, %v644_v7  ;;  %v665_v16 = vrot.slane %v656_v13, %v2145_v18  ;;  %v1563_v7 = vld [vmem:[%s2296_s3 + $0x4] sm:$0xf]  ;;  %s2003_s3 = smov [#allocation10]  }
 0x1c3   :  { %v1074_v8 = vrot.slane %v1563_v7, %v2125_v59  ;;  %v1407_v43 = vrot.slane %v1563_v7, %v2152_v63  ;;  %s1509_s23 = sshll.u32 %s2003_s3, 4  ;;  %s1510_s23 = int_to_ptr.vmem [resolvable:$true] %s1509_s23 }
 0x1c4   :  { %v659_v15 = vrot.slane %v657_v14, 7  ;;  %v666_v17 = vmul.f32 %v665_v16, %v637_v56  ;;  %v692_v56 = vrot.slane %v2252_v41, %v2152_v63  ;;  %s1960_s24 = scalar_lea.vmem %s1510_s23, 256  ;;  %p1965_p5 = scmp.lt.s32.totalorder %s1510_s23, %s1510_s23 }
 0x1c5   :  { %v1302_v2 = vadd.f32 %v1675_v40, %v1074_v8  ;;  %p1961_p4 = scmp.ne.s32.totalorder %s1510_s23, %s1960_s24  ;;  %p1966_p6 = scmp.lt.s32.totalorder %s1960_s24, %s1960_s24 }
 0x1c6   :  { %v661_v50 = vsub.f32 %v2252_v41, %v659_v15 }
 0x1c7   :  { %p1967_p7 = por %p1966_p6, %p1965_p5 }
 0x1c8   :  { %v670_v20 = vrot.slane %v661_v50, %v2128_v1 }
 0x1c9   :  { %p1968_p8 = pnand %p1967_p7, %p1961_p4 }
 0x1ca   :  { %v671_v23 = vadd.f32 %v670_v20, %v666_v17 }
 0x1cc   :  { %v672_v26 = vpack.c.bf16 %v671_v23, %v671_v23 }
 0x1ce   :  { %1727 = vmatmul.mubr.bf16.vlgmr.msra.gmra.mrb[4].mxu0 %v672_v26 }
 0x1cf   :  { %1680 = vmatpush3.bf16.msra.mxu0 %v1809_v24  ;;  %1339 = vmatprep.mubr.bf16.mxu0 %v1005_v25 }
 0x1d0   :  { %1681 = vmatprep.subr.bf16.mxu0 %v1812_v46 }
 0x1d3   :  { %1682 = vmatpush3.bf16.msra.mxu0 %v1813_v28 }
 0x1d4   :  { %1683 = vmatprep.subr.bf16.mxu0 %v1816_v45 }
 0x1d7   :  { %1684 = vmatpush3.bf16.msra.mxu0 %v1817_v29 }
 0x1d8   :  { %1685 = vmatprep.subr.bf16.mxu0 %v1820_v30 }
 0x1db   :  { %1686 = vmatpush3.bf16.msra.mxu0 %v1821_v31 }
 0x1dc   :  { %1687 = vmatprep.subr.bf16.mxu0 %v1824_v36 }
 0x1df   :  { %1688 = vmatpush3.bf16.msra.mxu0 %v1825_v33 }
 0x1e0   :  { %1689 = vmatprep.subr.bf16.mxu0 %v1828_v21 }
 0x1e3   :  { %1690 = vmatpush3.bf16.msra.mxu0 %v1829_v35 }
 0x1e4   :  { %1691 = vmatprep.subr.bf16.mxu0 %v1832_v22 }
 0x1e7   :  { %1692 = vmatpush3.bf16.msra.mxu0 %v1833_v48 }
 0x1e8   :  { %1693 = vmatprep.subr.bf16.mxu0 %v1834_v47 }
 0x1eb   :  { %1694 = vmatpush3.bf16.msra.mxu0 %v1835_v37 }
 0x1ee   :  { %1340 = vmatmul.mubr.bf16.vlgmr.msra.gmra.mrb[8].mxu0 %v1004_v34 }
 0x2a1   :  { %v775_v57 = vpop.f32.mrb[4].mxu0 }
 0x2a2   :  { %v776_v58 = vadd.f32 %v775_v57, %v692_v56  ;;  %v1728_v0 = vpop.f32.mrb[5].mxu0 }
 0x2a3   :  { %v778_v4 = vpop.f32.mrb[6].mxu0 }
 0x2a4   :  { %v1729_v5 = vpop.f32.mrb[7].mxu0  ;;  %v781_v6 = vmul.f32 %v776_v58, %v776_v58 }
 0x2a6   :  { %782 = vadd.xlane.f32.xlu0 %v781_v6 }
 0x2c1   :  { %v1695_v9 = vpop.f32.mrb[8].mxu0 }
 0x2c2   :  { %v1696_v27 = vpop.f32.mrb[9].mxu0 }
 0x2c3   :  { %v1697_v3 = vadd.f32 %v1696_v27, %v1695_v9  ;;  %v1698_v10 = vpop.f32.mrb[10].mxu0 }
 0x2c4   :  { %v1699_v19 = vpop.f32.mrb[11].mxu0 }
 0x2c5   :  { %v1342_v41 = vadd.f32 %v1697_v3, %v1302_v2 }
 0x2c7   :  { %v1348_v11 = vmul.f32 0.70710677, %v1342_v41  ;;  %v1347_v61 = vmul.f32 0.5, %v1342_v41 }
 0x2c9   :  { %1864 = verf.f32 %v1348_v11 }
 0x2d3   :  { %v1865_v60 = vpop.eup %1864 }
 0x2d4   :  { %v1350_v62 = vadd.f32 1.0, %v1865_v60 }
 0x2d6   :  { %v1351_v12 = vmul.f32 %v1350_v62, %v1347_v61 }
 0x2d8   :  { %v1352_v13 = vrot.slane %v1351_v12, 4 }
 0x2da   :  { %v1353_v14 = vadd.f32 %v1352_v13, %v1351_v12 }
 0x2dc   :  { %v1354_v15 = vrot.slane %v1353_v14, 2 }
 0x2de   :  { %v1355_v16 = vadd.f32 %v1354_v15, %v1353_v14 }
 0x2e0   :  { %v1356_v50 = vrot.slane %v1355_v16, 1 }
 0x2e2   :  { %v1357_v17 = vadd.f32 %v1356_v50, %v1355_v16 }
 0x2e4   :  { %v1358_v59 = vmul.f32 0.125, %v1357_v17 }
 0x2e6   :  { %v1359_v20 = vsub.f32 %v1351_v12, %v1358_v59 }
 0x2e8   :  { %v1360_v23 = vmul.f32 %v1359_v20, %v1359_v20 }
 0x2ea   :  { %v1361_v24 = vrot.slane %v1360_v23, 4 }
 0x2ec   :  { %v1362_v25 = vadd.f32 %v1361_v24, %v1360_v23 }
 0x2ee   :  { %v1363_v26 = vrot.slane %v1362_v25, 2 }
 0x2f0   :  { %v1364_v46 = vadd.f32 %v1363_v26, %v1362_v25 }
 0x2f2   :  { %v1365_v28 = vrot.slane %v1364_v46, 1 }
 0x2f4   :  { %v1366_v45 = vadd.f32 %v1365_v28, %v1364_v46 }
 0x2f6   :  { %v1367_v29 = vmul.f32 0.125, %v1366_v45 }
 0x2f8   :  { %v1368_v30 = vadd.f32 1e-05, %v1367_v29 }
 0x2fa   :  { %1866 = vrsqrt.f32 %v1368_v30 }
 0x304   :  { %v1867_v31 = vpop.eup %1866 }
 0x305   :  { %v1370_v36 = vmul.f32 %v1867_v31, %v1563_v7 }
 0x307   :  { %v1371_v33 = vmul.f32 %v1370_v36, %v1358_v59  ;;  %v1379_v35 = vrot.slane %v1370_v36, %v2145_v18 }
 0x309   :  { %v1373_v21 = vrot.slane %v1371_v33, 7  ;;  %v1380_v48 = vmul.f32 %v1379_v35, %v1351_v12 }
 0x30b   :  { %v1375_v22 = vsub.f32 %v1563_v7, %v1373_v21 }
 0x30d   :  { %v1384_v47 = vrot.slane %v1375_v22, %v2128_v1 }
 0x30f   :  { %v1385_v37 = vadd.f32 %v1384_v47, %v1380_v48 }
 0x311   :  { %v1386_v34 = vpack.c.bf16 %v1385_v37, %v1385_v37 }
 0x313   :  { %1747 = vmatmul.mubr.bf16.vlgmr.msra.gmra.mrb[8].mxu1 %v1386_v34 }
 0x333   :  { %v783_v38 = vpop.xlane.xlu0 %782 }
 0x334   :  { %v784_v39 = vadd.f32 1e-12, %v783_v38 }
 0x336   :  { %1868 = vrsqrt.f32 %v784_v39 }
 0x340   :  { %v1869_v40 = vpop.eup %1868 }
 0x341   :  { %v786_v42 = vmul.f32 %v1869_v40, %v776_v58 }
 0x343   :  { %787 = vst [vmem:[#allocation10] sm:$0xff] %v786_v42 }
 0x3e6   :  { %v1490_v44 = vpop.f32.mrb[8].mxu1 }
 0x3e7   :  { %v1491_v49 = vadd.f32 %v1490_v44, %v1407_v43  ;;  %v1748_v51 = vpop.f32.mrb[9].mxu1 }
 0x3e8   :  { %v1493_v52 = vpop.f32.mrb[10].mxu1 }
 0x3e9   :  { %v1749_v18 = vpop.f32.mrb[11].mxu1  ;;  %v1496_v32 = vmul.f32 %v1491_v49, %v1491_v49 }
 0x3eb   :  { %1497 = vadd.xlane.f32.xlu0 %v1496_v32 }
 0x478   :  { %v1498_v53 = vpop.xlane.xlu0 %1497 }
 0x479   :  { %v1499_v1 = vadd.f32 1e-12, %v1498_v53 }
 0x47b   :  { %1870 = vrsqrt.f32 %v1499_v1 }
 0x485   :  { %v1871_v54 = vpop.eup %1870 }
 0x486   :  { %v1501_v55 = vmul.f32 %v1871_v54, %v1491_v49 }
 0x488   :  { %1503 = vst [vmem:[#allocation10 + $0x8] sm:$0xff] %v1501_v55 }
 0x489   :  { %1971 = shalt.err (!%p1968_p8)
}
 0x48a   :  { %s1972_s27 = scalar_lea.hbm %s2298_s5, 256 }
 0x48b   :  { %p1973_p9 = scmp.ne.s32.totalorder %s2298_s5, %s1972_s27  ;;  %p1976_p10 = scmp.lt.u32.totalorder %s1972_s27, %s2298_s5 }
 0x48d   :  { %p1978_p11 = pnand %p1976_p10, %p1973_p9 }
 0x48f   :  { %1981 = shalt.err (!%p1978_p11)
}
 0x490   :  { %1515 = dma.vmem_to_hbm [thread:$0]  %s1510_s23, 256, %s2298_s5, [#allocation4], %s1991_s28, %s1991_s28, %s1992_s29  }
 0x491   :  { %1988 = dma.done.wait [#allocation4], 256  }
 0x492   :  { %1989 = vsyncadd [#allocation4], 4294967040 }
 0x493   :  { %1519 = vsyncpa [#allocation3], 1 }
 0x494   :  { %1520 = vsyncpa [#allocation6], 1 }
 0x495   :  { %1521 = vsyncpa [#allocation9], 1 }
 0x496   :  { %1522 = vsyncpa [#allocation4], 1 }

</bundles_post_ra>
